<compile_context>
chip_gen: v7x
topology: tpu7x:2x2x1
jax: 0.10.0
libtpu: 0.0.40
codegen_flags: <defaults>
</compile_context>

<pallas_src>
import functools

import jax
import jax.numpy as jnp
import numpy as np
from jax.experimental import pallas as pl
from jax.experimental.pallas import tpu as pltpu


def _round_up(x: int, m: int) -> int:
    return ((x + m - 1) // m) * m


def gaussian_decoder_kernel(z_ref, w1_ref, b1_ref, w2_ref, b2_ref, x_ref,
                            scalars_ref, mu_ref, nll_ref, h_ref):
    j = pl.program_id(1)

    # ---- hidden layer: compute once per batch tile (j == 0), reuse for all D tiles ----
    @pl.when(j == 0)
    def _():
        h = jnp.dot(z_ref[...], w1_ref[...],
                    preferred_element_type=jnp.float32) + b1_ref[...]
        h_ref[...] = jnp.maximum(h, 0.0).astype(h_ref.dtype)

    # ---- output layer for this D tile: bf16 operands, f32 accumulation on the MXU ----
    mu = jnp.dot(h_ref[...], w2_ref[...],
                 preferred_element_type=jnp.float32) + b2_ref[...]
    mu_ref[...] = mu

    # ---- Gaussian negative log-likelihood (f32 VPU math, scalars pre-hoisted) ----
    inv_two_var = scalars_ref[0]          # 1 / (2 * sigma^2)
    log_const = scalars_ref[1]            # logscale + 0.5 * log(2*pi)
    diff = x_ref[...] - mu
    nll_ref[...] = diff * diff * inv_two_var + log_const


@functools.partial(jax.jit, static_argnames=("tb", "td"))
def gaussian_decoder_forward(z, x, params, *, tb=256, td=512):
    """z: [B, S] latent; x: [B, C, H, W] target. Returns (mu_x, neg_logpx_z) as NCHW."""
    B, S = z.shape
    C, H, W = x.shape[1:]
    D = C * H * W
    HID = params["w1"].shape[1]

    # Tile sizes: sublane-multiple batch tile, lane-multiple feature tile.
    TB = min(tb, _round_up(B, 8))
    TD = min(td, _round_up(D, 128))
    B_pad = _round_up(B, TB)
    D_pad = _round_up(D, TD)

    z_p = jnp.zeros((B_pad, S), jnp.float32).at[:B, :].set(z.astype(jnp.float32))
    x_p = jnp.zeros((B_pad, D_pad), jnp.float32).at[:B, :D].set(
        x.reshape(B, D).astype(jnp.float32))

    w1 = params["w1"].astype(jnp.float32)
    b1 = params["b1"].astype(jnp.float32)
    # w2 [HID, D] is the largest HBM stream: send it bf16 (f32 accumulation in kernel).
    w2 = jnp.zeros((HID, D_pad), jnp.bfloat16).at[:, :D].set(
        params["w2"].astype(jnp.bfloat16))
    b2 = jnp.zeros((1, D_pad), jnp.float32).at[:, :D].set(
        params["b2"].astype(jnp.float32))

    # Hoist the logscale scalar math out of the kernel.
    logscale = params["logscale"].astype(jnp.float32).reshape(())
    inv_two_var = 0.5 * jnp.exp(-2.0 * logscale)                 # 1 / (2 sigma^2)
    log_const = logscale + jnp.float32(0.5 * np.log(2.0 * np.pi))
    scalars = jnp.stack([inv_two_var, log_const]).astype(jnp.float32)

    grid = (B_pad // TB, D_pad // TD)
    smem = pl.BlockSpec(memory_space=pltpu.MemorySpace.SMEM)

    mu_p, nll_p = pl.pallas_call(
        gaussian_decoder_kernel,
        out_shape=(jax.ShapeDtypeStruct((B_pad, D_pad), jnp.float32),
                   jax.ShapeDtypeStruct((B_pad, D_pad), jnp.float32)),
        grid_spec=pltpu.PrefetchScalarGridSpec(
            num_scalar_prefetch=0,
            grid=grid,
            in_specs=[
                pl.BlockSpec((TB, S), lambda i, j: (i, 0)),     # z: per batch tile
                pl.BlockSpec((S, HID), lambda i, j: (0, 0)),    # w1: resident
                pl.BlockSpec((1, HID), lambda i, j: (0, 0)),    # b1: resident
                pl.BlockSpec((HID, TD), lambda i, j: (0, j)),   # w2 tile (bf16)
                pl.BlockSpec((1, TD), lambda i, j: (0, j)),     # b2 tile
                pl.BlockSpec((TB, TD), lambda i, j: (i, j)),    # x tile
                smem,                                           # precomputed scalars
            ],
            out_specs=(
                pl.BlockSpec((TB, TD), lambda i, j: (i, j)),    # mu
                pl.BlockSpec((TB, TD), lambda i, j: (i, j)),    # nll
            ),
            scratch_shapes=[pltpu.VMEM((TB, HID), jnp.bfloat16)],  # hidden activations
        ),
        compiler_params=pltpu.CompilerParams(
            dimension_semantics=("parallel", "arbitrary"),
            vmem_limit_bytes=48 * 1024 * 1024,
        ),
    )(z_p, w1, b1, w2, b2, x_p, scalars)

    mu = mu_p[:B, :D].reshape(B, C, H, W)
    nll = nll_p[:B, :D].reshape(B, C, H, W)
    return mu, nll


def init_params(key, s_dim, n_hidden, out_dim, scale=0.0):
    """Deterministic synthetic parameters for the decoder MLP + logscale."""
    k1, k2, k3, k4 = jax.random.split(key, 4)
    # Weights stored pre-transposed ([in, out]) so the kernel does z @ W1 @ W2.
    w1 = jax.random.normal(k1, (s_dim, n_hidden), jnp.float32) / np.sqrt(s_dim)
    b1 = jax.random.normal(k2, (1, n_hidden), jnp.float32) * 0.01
    w2 = jax.random.normal(k3, (n_hidden, out_dim), jnp.float32) / np.sqrt(n_hidden)
    b2 = jax.random.normal(k4, (1, out_dim), jnp.float32) * 0.01
    logscale = jnp.array([scale], dtype=jnp.float32)   # nn.Parameter(torch.tensor([scale]))
    return {"w1": w1, "b1": b1, "w2": w2, "b2": b2, "logscale": logscale}


if __name__ == "__main__":
    # Small shapes consistent with the module: latent z [B, S], image x [B, C, H, W].
    B, S, HID = 2, 32, 64
    C, H, W = 4, 16, 16

    key = jax.random.PRNGKey(0)
    kz, kx, kp = jax.random.split(key, 3)
    z = jax.random.normal(kz, (B, S), jnp.float32)
    x = jax.random.normal(kx, (B, C, H, W), jnp.float32)
    params = init_params(kp, S, HID, C * H * W, scale=0.0)

    mu_x, neg_logpx_z = gaussian_decoder_forward(z, x, params)
    jax.block_until_ready((mu_x, neg_logpx_z))

    # Pure-JAX reference of the same math (second matmul uses the same bf16-weight path).
    h_ref = jnp.maximum(
        jnp.dot(z, params["w1"], precision=jax.lax.Precision.HIGHEST) + params["b1"], 0.0)
    mu_ref = jnp.dot(h_ref.astype(jnp.bfloat16), params["w2"].astype(jnp.bfloat16),
                     preferred_element_type=jnp.float32) + params["b2"]
    mu_ref = mu_ref.reshape(B, C, H, W)
    sigma = jnp.exp(params["logscale"][0])
    nll_ref = ((x - mu_ref) ** 2) / (2.0 * sigma * sigma) \
        + jnp.log(sigma) + 0.5 * jnp.log(2.0 * jnp.pi)

    assert jnp.allclose(mu_x, mu_ref, atol=2e-2, rtol=2e-2), \
        float(jnp.max(jnp.abs(mu_x - mu_ref)))
    assert jnp.allclose(neg_logpx_z, nll_ref, atol=2e-2, rtol=2e-2), \
        float(jnp.max(jnp.abs(neg_logpx_z - nll_ref)))

    print("KERNEL_OK")
</pallas_src>

<mosaic_0001>
module attributes {stable_mosaic.version = 11 : i64} {
  func.func @gaussian_decoder_kernel(%arg0: i32, %arg1: i32, %arg2: memref<8x32xf32, #tpu.memory_space<vmem>>, %arg3: memref<32x64xf32, #tpu.memory_space<vmem>>, %arg4: memref<1x64xf32, #tpu.memory_space<vmem>>, %arg5: memref<64x512xbf16, #tpu.memory_space<vmem>>, %arg6: memref<1x512xf32, #tpu.memory_space<vmem>>, %arg7: memref<8x512xf32, #tpu.memory_space<vmem>>, %arg8: memref<2xf32, #tpu.memory_space<smem>>, %arg9: memref<8x512xf32, #tpu.memory_space<vmem>>, %arg10: memref<8x512xf32, #tpu.memory_space<vmem>>, %arg11: memref<8x64xbf16, #tpu.memory_space<vmem>>) attributes {dimension_semantics = [#tpu.dimension_semantics<parallel>, #tpu.dimension_semantics<arbitrary>], iteration_bounds = array<i64: 1, 2>, scalar_prefetch = 0 : i64, scratch_operands = 1 : i64, tpu.core_type = #tpu.core_type<tc>, window_params = [{transform_indices = @transform_0, window_bounds = array<i64: 8, 32>}, {pipeline_mode = #tpu.pipeline_mode<synchronous>, transform_indices = @transform_1, window_bounds = array<i64: 32, 64>}, {pipeline_mode = #tpu.pipeline_mode<synchronous>, transform_indices = @transform_2, window_bounds = array<i64: 1, 64>}, {transform_indices = @transform_3, window_bounds = array<i64: 64, 512>}, {transform_indices = @transform_4, window_bounds = array<i64: 1, 512>}, {transform_indices = @transform_5, window_bounds = array<i64: 8, 512>}, {transform_indices = @transform_6, window_bounds = array<i64: 2>}, {transform_indices = @transform_7, window_bounds = array<i64: 8, 512>}, {transform_indices = @transform_8, window_bounds = array<i64: 8, 512>}]} {
    %c0_i32 = arith.constant 0 : i32
    %0 = arith.cmpi eq, %arg1, %c0_i32 : i32
    %1 = arith.extui %0 : i1 to i32
    %c0_i32_0 = arith.constant 0 : i32
    %2 = arith.cmpi ne, %1, %c0_i32_0 : i32
    scf.if %2 {
      %c0_13 = arith.constant 0 : index
      %c0_14 = arith.constant 0 : index
      %20 = vector.load %arg2[%c0_13, %c0_14] : memref<8x32xf32, #tpu.memory_space<vmem>>, vector<8x32xf32>
      %c0_15 = arith.constant 0 : index
      %c0_16 = arith.constant 0 : index
      %21 = vector.load %arg3[%c0_15, %c0_16] : memref<32x64xf32, #tpu.memory_space<vmem>>, vector<32x64xf32>
      %cst_17 = arith.constant dense<0.000000e+00> : vector<8x64xf32>
      %22 = tpu.matmul %20, %21, %cst_17 {dimension_numbers = #tpu.dot_dimension_numbers<[1], [0], [0], [1], [0, 0, 1, 1], [], []>} : vector<8x32xf32>, vector<32x64xf32>, vector<8x64xf32> -> vector<8x64xf32>
      %c0_18 = arith.constant 0 : index
      %c0_19 = arith.constant 0 : index
      %23 = vector.load %arg4[%c0_18, %c0_19] : memref<1x64xf32, #tpu.memory_space<vmem>>, vector<1x64xf32>
      %24 = vector.broadcast %23 : vector<1x64xf32> to vector<8x64xf32>
      %25 = arith.addf %22, %24 : vector<8x64xf32>
      %cst_20 = arith.constant 0.000000e+00 : f32
      %26 = vector.broadcast %cst_20 : f32 to vector<8x64xf32>
      %27 = arith.maximumf %25, %26 : vector<8x64xf32>
      %28 = arith.truncf %27 : vector<8x64xf32> to vector<8x64xbf16>
      %c0_21 = arith.constant 0 : index
      %c0_22 = arith.constant 0 : index
      %29 = vector.load %arg11[%c0_21, %c0_22] : memref<8x64xbf16, #tpu.memory_space<vmem>>, vector<8x64xbf16>
      tpu.vector_store %arg11[%c0_21, %c0_22], %28 {strides = array<i32>} : memref<8x64xbf16, #tpu.memory_space<vmem>>, vector<8x64xbf16>,
    } else {
    }
    %c0 = arith.constant 0 : index
    %c0_1 = arith.constant 0 : index
    %3 = vector.load %arg11[%c0, %c0_1] : memref<8x64xbf16, #tpu.memory_space<vmem>>, vector<8x64xbf16>
    %c0_2 = arith.constant 0 : index
    %c0_3 = arith.constant 0 : index
    %4 = vector.load %arg5[%c0_2, %c0_3] : memref<64x512xbf16, #tpu.memory_space<vmem>>, vector<64x512xbf16>
    %cst = arith.constant dense<0.000000e+00> : vector<8x512xf32>
    %5 = tpu.matmul %3, %4, %cst {dimension_numbers = #tpu.dot_dimension_numbers<[1], [0], [0], [1], [0, 0, 1, 1], [], []>} : vector<8x64xbf16>, vector<64x512xbf16>, vector<8x512xf32> -> vector<8x512xf32>
    %c0_4 = arith.constant 0 : index
    %c0_5 = arith.constant 0 : index
    %6 = vector.load %arg6[%c0_4, %c0_5] : memref<1x512xf32, #tpu.memory_space<vmem>>, vector<1x512xf32>
    %7 = vector.broadcast %6 : vector<1x512xf32> to vector<8x512xf32>
    %8 = arith.addf %5, %7 : vector<8x512xf32>
    %c0_6 = arith.constant 0 : index
    %c0_7 = arith.constant 0 : index
    %9 = vector.load %arg9[%c0_6, %c0_7] : memref<8x512xf32, #tpu.memory_space<vmem>>, vector<8x512xf32>
    tpu.vector_store %arg9[%c0_6, %c0_7], %8 {strides = array<i32>} : memref<8x512xf32, #tpu.memory_space<vmem>>, vector<8x512xf32>,
    %c0_8 = arith.constant 0 : index
    %10 = memref.load %arg8[%c0_8] : memref<2xf32, #tpu.memory_space<smem>>
    %c1 = arith.constant 1 : index
    %11 = memref.load %arg8[%c1] : memref<2xf32, #tpu.memory_space<smem>>
    %c0_9 = arith.constant 0 : index
    %c0_10 = arith.constant 0 : index
    %12 = vector.load %arg7[%c0_9, %c0_10] : memref<8x512xf32, #tpu.memory_space<vmem>>, vector<8x512xf32>
    %13 = arith.subf %12, %8 : vector<8x512xf32>
    %14 = arith.mulf %13, %13 : vector<8x512xf32>
    %15 = vector.broadcast %10 : f32 to vector<8x512xf32>
    %16 = arith.mulf %14, %15 : vector<8x512xf32>
    %17 = vector.broadcast %11 : f32 to vector<8x512xf32>
    %18 = arith.addf %16, %17 : vector<8x512xf32>
    %c0_11 = arith.constant 0 : index
    %c0_12 = arith.constant 0 : index
    %19 = vector.load %arg10[%c0_11, %c0_12] : memref<8x512xf32, #tpu.memory_space<vmem>>, vector<8x512xf32>
    tpu.vector_store %arg10[%c0_11, %c0_12], %18 {strides = array<i32>} : memref<8x512xf32, #tpu.memory_space<vmem>>, vector<8x512xf32>,
    return
  }
  func.func @transform_0(%arg0: i32, %arg1: i32) -> (i32, i32) {
    %c0_i32 = arith.constant 0 : i32
    %c0_i32_0 = arith.constant 0 : i32
    return %arg0, %c0_i32 : i32, i32
  }
  func.func @transform_1(%arg0: i32, %arg1: i32) -> (i32, i32) {
    %c0_i32 = arith.constant 0 : i32
    %c0_i32_0 = arith.constant 0 : i32
    %c0_i32_1 = arith.constant 0 : i32
    return %c0_i32, %c0_i32_0 : i32, i32
  }
  func.func @transform_2(%arg0: i32, %arg1: i32) -> (i32, i32) {
    %c0_i32 = arith.constant 0 : i32
    %c0_i32_0 = arith.constant 0 : i32
    %c0_i32_1 = arith.constant 0 : i32
    return %c0_i32, %c0_i32_0 : i32, i32
  }
  func.func @transform_3(%arg0: i32, %arg1: i32) -> (i32, i32) {
    %c0_i32 = arith.constant 0 : i32
    %c0_i32_0 = arith.constant 0 : i32
    return %c0_i32, %arg1 : i32, i32
  }
  func.func @transform_4(%arg0: i32, %arg1: i32) -> (i32, i32) {
    %c0_i32 = arith.constant 0 : i32
    %c0_i32_0 = arith.constant 0 : i32
    return %c0_i32, %arg1 : i32, i32
  }
  func.func @transform_5(%arg0: i32, %arg1: i32) -> (i32, i32) {
    %c0_i32 = arith.constant 0 : i32
    return %arg0, %arg1 : i32, i32
  }
  func.func @transform_6(%arg0: i32, %arg1: i32) -> i32 {
    %c0_i32 = arith.constant 0 : i32
    %c0_i32_0 = arith.constant 0 : i32
    return %c0_i32 : i32
  }
  func.func @transform_7(%arg0: i32, %arg1: i32) -> (i32, i32) {
    %c0_i32 = arith.constant 0 : i32
    return %arg0, %arg1 : i32, i32
  }
  func.func @transform_8(%arg0: i32, %arg1: i32) -> (i32, i32) {
    %c0_i32 = arith.constant 0 : i32
    return %arg0, %arg1 : i32, i32
  }
}

</mosaic_0001>

<bundles_post_ra>
// kernel: gaussian_decoder_forward.1
= control target key start
LH: loop header
LB: loop body
LE: loop exit
PB: predicated region body
PF: predicated region fallthrough
CT: control target
= control target key end

     0   :  { %14 = vsyncpa [#allocation5], 0  ;;  %s1267_s27 = smov 0   ;;  %s1269_s28 = smov 0   ;;  %s1451_s0 = inlined_call_operand.vmem [shape: f32[8,32], index: 0, kind: input, shape index: {}]   ;;  %s1452_s1 = inlined_call_operand.vmem [shape: f32[32,64], index: 1, kind: input, shape index: {}]   ;;  %s1453_s2 = inlined_call_operand.vmem [shape: f32[1,64], index: 2, kind: input, shape index: {}]   ;;  %s1454_s3 = inlined_call_operand.vmem [shape: bf16[64,1024], index: 3, kind: input, shape index: {}]   ;;  %s1455_s4 = inlined_call_operand.vmem [shape: f32[1,1024], index: 4, kind: input, shape index: {}]   ;;  %s1456_s5 = inlined_call_operand.vmem [shape: f32[8,1024], index: 5, kind: input, shape index: {}]   ;;  %s1457_s6 = inlined_call_operand.vmem [shape: f32[2], index: 6, kind: input, shape index: {}]   ;;  %s1458_s7 = inlined_call_operand.vmem [shape: f32[8,1024], index: 7, kind: output, shape index: {0}]   ;;  %s1459_s8 = inlined_call_operand.vmem [shape: f32[8,1024], index: 8, kind: output, shape index: {1}]  }
   0x1   :  { %s1271_s29 = smov 0   ;;  %s1273_s30 = smov 0  }
   0x2   :  { %s1275_s9 = smov 0  }
   0x3 LB: > { %s1013_s10 = sadd.s32 4294967295, %s1215_s9   ;;  %s29_s11 = sadd.s32 1, %s1211_s30  ;;  %s1215_s9 = sphi %s1275_s9, %s20_s9   ;;  %s1211_s30 = sphi %s1273_s30, %s1466_s30   ;;  %s1207_s29 = sphi %s1271_s29, %s1465_s29   ;;  %s1203_s28 = sphi %s1269_s28, %s1464_s28   ;;  %s1199_s27 = sphi %s1267_s27, %s1463_s27  }
   0x4   : > { %p30_p0 = scmp.ge.s32.totalorder %s29_s11, 2  ;;  %s107_s12 = sadd.s32 1, %s1203_s28 }
   0x5   : > { %p114_p1 = scmp.ne.s32.totalorder %s1203_s28, %s1199_s27  ;;  %p115_p2 = scmp.eq.s32.totalorder %s1215_s9, 0 }
   0x6   : > { %s1468_s11 = smov (%p30_p0, %s29_s11), 0  ;;  %p1015_p4 = scmp.ge.s32.totalorder %s1215_s9, 1 }
   0x7   : > { %p1300_p3 = por %p115_p2, %p114_p1  ;;  %s104_s14 = ssub.s32 %s1211_s30, %s1468_s11 }
   0x8   : > { %p262_p5 = scmp.lt.s32.totalorder %s1215_s9, 3  ;;  %p105_p6 = scmp.eq.s32.totalorder %s104_s14, 0 }
   0x9   : > { %p1312_p8 = scmp.eq.s32.totalorder %s1013_s10, 0  ;;  %s288_s20 = sshll.u32 %s1457_s6, 4  ;;  %s289_s20 = int_to_ptr.vmem [resolvable:$true] %s288_s20 }
   0xa   : > { %p1308_p7 = pnand %p1015_p4, %p262_p5  ;;  %s1158_s21 = scalar_lea.vmem %s289_s20, 16 }
   0xb   : > { %s1317_s17 = scalar_select %p105_p6, %s1203_s28, %s107_s12  }
   0xc   : > { %p1083_p9 = pneg %p1308_p7  ;;  %p1159_p11 = scmp.ne.s32.totalorder %s289_s20, %s1158_s21 }
   0xd   : > { %p1166_p1 = scmp.lt.s32.totalorder %s289_s20, %s289_s20  ;;  %p1167_p2 = scmp.lt.s32.totalorder %s1158_s21, %s1158_s21 }
   0xe   : > { %p1084_p10 = pnand %p1312_p8, %p1083_p9 }
   0xf   : > { %p1168_p4 = por %p1167_p2, %p1166_p1 }
  0x10   : > { %p1160_p12 = pneg %p1084_p10 }
  0x12   : > { %p1161_p13 = pnand %p1160_p12, %p1159_p11 }
  0x14   : > { %p1162_p0 = pneg %p1161_p13 }
  0x16   : > { %p1169_p5 = pnand %p1168_p4, %p1162_p0 }
  0x18   : > { %1172 = shalt.err (!%p1169_p5)
}
  0x19   : > { %s1217_s22 = smov [#allocation4]   ;;  %p1018_p6 = scmp.ge.s32.totalorder %s1215_s9, 2 }
  0x1a   : > { %1086 = dma.vmem_to_smem (!%p1084_p10), %s289_s20, 16, %s1217_s22, [#allocation5]  }
  0x1b   : > { %295 = sbr.rel (%p1018_p6) target bundleno = 46 (0x2e), region = 32 }
  0x22   : > { %298 = sbr.rel (!%p1300_p3) target bundleno = 46 (0x2e), region = 36  ;;  %s300_s23 = sand.u32 (%p1300_p3), 1, %s1203_s28  }
  0x23   : > { %s1056_s24 = sshll.u32 (%p1300_p3), %s1211_s30, 4  ;;  %s1019_s25 = sshll.u32 (%p1300_p3), %s300_s23, 7 }
  0x24   : > { %s1334_s12 = scalar_lea.vmem (%p1300_p3), %s1454_s3, %s1056_s24  ;;  %s302_s13 = scalar_lea.vmem (%p1300_p3), [#allocation3], %s1019_s25 }
  0x25   : > { %v318_v0 = vld [vmem:[%s1334_s12] sm:$0xff] (%p1300_p3)  ;;  %v320_v1 = vld [vmem:[%s1334_s12 + $0x8] sm:$0xff] (%p1300_p3) }
  0x26   : > { %v322_v2 = vld [vmem:[%s1334_s12 + $0x20] sm:$0xff] (%p1300_p3)  ;;  %319 = vst [vmem:[%s302_s13] sm:$0xff] (%p1300_p3), %v318_v0  ;;  %321 = vst [vmem:[%s302_s13 + $0x8] sm:$0xff] (%p1300_p3), %v320_v1  ;;  %v324_v3 = vld [vmem:[%s1334_s12 + $0x28] sm:$0xff] (%p1300_p3) }
  0x27   : > { %323 = vst [vmem:[%s302_s13 + $0x10] sm:$0xff] (%p1300_p3), %v322_v2  ;;  %v326_v4 = vld [vmem:[%s1334_s12 + $0x40] sm:$0xff] (%p1300_p3)  ;;  %v328_v5 = vld [vmem:[%s1334_s12 + $0x48] sm:$0xff] (%p1300_p3)  ;;  %325 = vst [vmem:[%s302_s13 + $0x18] sm:$0xff] (%p1300_p3), %v324_v3 }
  0x28   : > { %327 = vst [vmem:[%s302_s13 + $0x20] sm:$0xff] (%p1300_p3), %v326_v4  ;;  %329 = vst [vmem:[%s302_s13 + $0x28] sm:$0xff] (%p1300_p3), %v328_v5  ;;  %v330_v6 = vld [vmem:[%s1334_s12 + $0x60] sm:$0xff] (%p1300_p3)  ;;  %v332_v7 = vld [vmem:[%s1334_s12 + $0x68] sm:$0xff] (%p1300_p3) }
  0x29   : > { %v334_v8 = vld [vmem:[%s1334_s12 + $0x80] sm:$0xff]  ;;  %331 = vst [vmem:[%s302_s13 + $0x30] sm:$0xff] %v330_v6  ;;  %333 = vst [vmem:[%s302_s13 + $0x38] sm:$0xff] %v332_v7  ;;  %v336_v9 = vld [vmem:[%s1334_s12 + $0x88] sm:$0xff] }
  0x2a   : > { %335 = vst [vmem:[%s302_s13 + $0x40] sm:$0xff] %v334_v8  ;;  %v338_v10 = vld [vmem:[%s1334_s12 + $0xa0] sm:$0xff]  ;;  %v340_v11 = vld [vmem:[%s1334_s12 + $0xa8] sm:$0xff]  ;;  %337 = vst [vmem:[%s302_s13 + $0x48] sm:$0xff] %v336_v9 }
  0x2b   : > { %339 = vst [vmem:[%s302_s13 + $0x50] sm:$0xff] %v338_v10  ;;  %341 = vst [vmem:[%s302_s13 + $0x58] sm:$0xff] %v340_v11  ;;  %v342_v12 = vld [vmem:[%s1334_s12 + $0xc0] sm:$0xff]  ;;  %v344_v13 = vld [vmem:[%s1334_s12 + $0xc8] sm:$0xff] }
  0x2c   : > { %v346_v14 = vld [vmem:[%s1334_s12 + $0xe0] sm:$0xff]  ;;  %343 = vst [vmem:[%s302_s13 + $0x60] sm:$0xff] %v342_v12  ;;  %345 = vst [vmem:[%s302_s13 + $0x68] sm:$0xff] %v344_v13  ;;  %v348_v15 = vld [vmem:[%s1334_s12 + $0xe8] sm:$0xff] }
  0x2d   : > { %347 = vst [vmem:[%s302_s13 + $0x70] sm:$0xff] %v346_v14  ;;  %349 = vst [vmem:[%s302_s13 + $0x78] sm:$0xff] %v348_v15 }
  0x2e PF: > { %379 = sbr.rel (%p1308_p7) target bundleno = 528 (0x210), region = 67  ;;  %s382_s14 = sand.u32 (!%p1308_p7), 1, %s1199_s27  }
  0x2f   : > { %s1023_s18 = sshll.u32 (!%p1308_p7), %s382_s14, 7 }
  0x30   : > { %s1355_s19 = scalar_lea.vmem (!%p1308_p7), [#allocation3], %s1023_s18 }
  0x35   : > { %1194 = dma.done.wait (%p1312_p8), [#allocation5], 16  }
  0x36   : > { %1196 = vsyncadd (%p1312_p8), [#allocation5], 4294967280 }
  0x37   : > { %392 = sfence }
  0x38   : > { %s1025_s20 = sshll.u32 %s1207_s29, 2  ;;  %p1032_p7 = scmp.ne.s32.totalorder %s1207_s29, 0 }
  0x39   : > { %p456_p3 = scmp.lt.s32.totalorder %s1025_s20, 7  ;;  %v496_v16 = vld [vmem:[%s1452_s1] sm:$0xff] (!%p1032_p7)  ;;  %v497_v17 = vld [vmem:[%s1452_s1 + $0x8] sm:$0xff] (!%p1032_p7)  ;;  %v498_v18 = vld [vmem:[%s1452_s1 + $0x10] sm:$0xff] (!%p1032_p7)  ;;  %v1218_v19 = vmov (!%p1032_p7), 0.0|0.0   ;;  %vm1219_vm0 = vmmov (!%p1032_p7), 0  }
  0x3a   : > { %494 = sbr.rel (%p1032_p7) target bundleno = 286 (0x11e), region = 79  ;;  %1073 = vmatprep.subr.bf16.mxu0 (!%p1032_p7), %v1218_v19  ;;  %v1074_v20 = vpack.c.bf16 (!%p1032_p7), %v497_v17, %v496_v16  ;;  %v499_v21 = vld [vmem:[%s1452_s1 + $0x18] sm:$0xff] (!%p1032_p7)  ;;  %v1220_v22 = vmov (!%p1032_p7), 0.0   ;;  %v495_v24 = vld [vmem:[%s1451_s0] sm:$0xff] (!%p1032_p7)  ;;  %vm507_vm1 = vcmask (!%p1032_p7), 261120   ;;  %vm583_vm2 = vcmask (!%p1032_p7), 519168  }
  0x3b   : > { %s1470_s20 = smov (!%p456_p3, %s1025_s20), 7  ;;  %1070 = vmatprep.mubr.msk.f32.mxu0 (!%p1032_p7), %vm1219_vm0, %v1220_v22  ;;  %v1077_v23 = vpack.c.bf16 (!%p1032_p7), %v499_v21, %v498_v18  ;;  %v1033_v25 = vld [vmem:[%s1453_s2] ss:$0 sm:$0xff] (!%p1032_p7) }
  0x3c   : > { %s458_s27 = scalar_lea.vmem %s1455_s4, %s1470_s20  ;;  %s1027_s22 = sshll.u32 %s1470_s20, 3  ;;  %1075 = vmatpush3.bf16.msra.mxu0 (!%p1032_p7), %v1074_v20 }
  0x3d   : > { %s1372_s25 = scalar_lea.vmem %s1456_s5, %s1027_s22  ;;  %s1377_s10 = scalar_lea.vmem %s1458_s7, %s1027_s22  ;;  %1076 = vmatprep.subr.bf16.mxu0 (!%p1032_p7), %v1218_v19 }
  0x3e   : > { %s1382_s14 = scalar_lea.vmem %s1459_s8, %s1027_s22 }
  0x40   : > { %1078 = vmatpush3.bf16.msra.mxu0 (!%p1032_p7), %v1077_v23 }
  0x43   : > { %1071 = vmatmul.mubr.msk.f32.vlgmr.msra.gmra.mrb[0].mxu0 %vm507_vm1, %v495_v24 }
 0x116   : > { %v577_v26 = vpop.f32.mrb[0].mxu0 }
 0x117   : > { %v578_v27 = vadd.f32 %v1033_v25, %v577_v26  ;;  %v1072_v28 = vpop.f32.mrb[1].mxu0 }
 0x119   : > { %v581_v29 = vmax.f32 %v578_v27, 0.0 }
 0x11b   : > { %v582_v30 = vpack.c.bf16 %v581_v29, %v581_v29 }
 0x11d   : > { %584 = vst.msk [vmem:[#allocation2] sm:$0xf] %vm583_vm2, %v582_v30 }
 0x11e PF: > { %v1134_v31 = vld [vmem:[%s1355_s19 + $0x4] ss:$16 sps:$4 sm:$0xff]   ;;  %v1136_v32 = vld [vmem:[%s1355_s19 + $0xc] ss:$16 sps:$4 sm:$0xff]   ;;  %v1221_v33 = vmov 0   ;;  %vm704_vm3 = vcmask 523264   ;;  %v604_v49 = vlaneseq }
 0x11f   : > { %740 = vmatprep.mubr.bf16.mxu0 %v1221_v33  ;;  %781 = vmatprep.mubr.bf16.mxu1 %v1221_v33  ;;  %v1138_v34 = vld [vmem:[%s1355_s19] ss:$16 sps:$4 sm:$0xff]   ;;  %v1139_v35 = vld [vmem:[%s1355_s19 + $0x8] ss:$16 sps:$4 sm:$0xff]   ;;  %v1140_v36 = vld [vmem:[%s1355_s19 + $0x24] ss:$16 sps:$4 sm:$0xff]  }
 0x120   : > { %708 = vmatprep.subr.bf16.mxu0 %v1134_v31  ;;  %749 = vmatprep.subr.bf16.mxu1 %v1136_v32  ;;  %v1142_v37 = vld [vmem:[%s1355_s19 + $0x2c] ss:$16 sps:$4 sm:$0xff]   ;;  %v1144_v38 = vld [vmem:[%s1355_s19 + $0x20] ss:$16 sps:$4 sm:$0xff]   ;;  %v1145_v39 = vld [vmem:[%s1355_s19 + $0x28] ss:$16 sps:$4 sm:$0xff]  }
 0x121   : > { %709 = vmatpush1.bf16.msra.mxu0 %v1138_v34  ;;  %750 = vmatpush1.bf16.msra.mxu1 %v1139_v35  ;;  %v1146_v40 = vld [vmem:[%s1355_s19 + $0x44] ss:$16 sps:$4 sm:$0xff]   ;;  %v1148_v41 = vld [vmem:[%s1355_s19 + $0x4c] ss:$16 sps:$4 sm:$0xff]   ;;  %v1150_v42 = vld [vmem:[%s1355_s19 + $0x40] ss:$16 sps:$4 sm:$0xff]  }
 0x122   : > { %710 = vmatprep.subr.bf16.mxu0 %v1140_v36  ;;  %751 = vmatprep.subr.bf16.mxu1 %v1142_v37  ;;  %v1151_v43 = vld [vmem:[%s1355_s19 + $0x48] ss:$16 sps:$4 sm:$0xff]   ;;  %v1152_v44 = vld [vmem:[%s1355_s19 + $0x64] ss:$16 sps:$4 sm:$0xff]   ;;  %v1154_v45 = vld [vmem:[%s1355_s19 + $0x6c] ss:$16 sps:$4 sm:$0xff]  }
 0x123   : > { %v1156_v46 = vld [vmem:[%s1355_s19 + $0x60] ss:$16 sps:$4 sm:$0xff]   ;;  %v1157_v47 = vld [vmem:[%s1355_s19 + $0x68] ss:$16 sps:$4 sm:$0xff]   ;;  %v605_v50 = vshrl.u32 %v604_v49, 7  ;;  %s794_s19 = sld [smem:[#allocation4]] }
 0x124   : > { %v585_v48 = vld [vmem:[#allocation2] sm:$0xf]  ;;  %s1053_s23 = sld [smem:[#allocation4 + $0x1]]  ;;  %v798_v63 = vld [vmem:[%s1372_s25 + $0x10] sm:$0xff]  ;;  %v797_v3 = vld [vmem:[%s1372_s25 + $0x8] sm:$0xff] }
 0x125   : > { %711 = vmatpush1.bf16.msra.mxu0 %v1144_v38  ;;  %752 = vmatpush1.bf16.msra.mxu1 %v1145_v39  ;;  %v606_v51 = vsub.s32 0, %v605_v50  ;;  %v614_v52 = vsub.s32 2, %v605_v50  ;;  %v602_v53 = vld [vmem:[%s458_s27] sm:$0xf]  ;;  %v610_v54 = vsub.s32 1, %v605_v50  ;;  %v618_v55 = vsub.s32 3, %v605_v50 }
 0x126   : > { %712 = vmatprep.subr.bf16.mxu0 %v1146_v40  ;;  %753 = vmatprep.subr.bf16.mxu1 %v1148_v41  ;;  %v796_v61 = vld [vmem:[%s1372_s25] sm:$0xff]  ;;  %v799_v5 = vld [vmem:[%s1372_s25 + $0x18] sm:$0xff] }
 0x127   : > { %v607_v56 = vrot.slane %v602_v53, %v606_v51  ;;  %v615_v57 = vrot.slane %v602_v53, %v614_v52  ;;  %v611_v58 = vrot.slane %v602_v53, %v610_v54  ;;  %v619_v59 = vrot.slane %v602_v53, %v618_v55 }
 0x129   : > { %713 = vmatpush1.bf16.msra.mxu0 %v1150_v42  ;;  %754 = vmatpush1.bf16.msra.mxu1 %v1151_v43  ;;  %v808_v14 = vstv %s794_s19 }
 0x12a   : > { %714 = vmatprep.subr.bf16.mxu0 %v1152_v44  ;;  %755 = vmatprep.subr.bf16.mxu1 %v1154_v45  ;;  %v813_v19 = vstv %s1053_s23 }
 0x12d   : > { %715 = vmatpush1.bf16.msra.mxu0 %v1156_v46  ;;  %756 = vmatpush1.bf16.msra.mxu1 %v1157_v47 }
 0x130   : > { %1051 = vmatmul.mubr.msk.bf16.vlgmr.msra.gmra.mrb[0].mxu0 %vm704_vm3, %v585_v48  ;;  %1052 = vmatmul.mubr.msk.bf16.vlgmr.msra.gmra.mrb[0].mxu1 %vm704_vm3, %v585_v48 }
 0x203   : > { %v742_v60 = vpop.f32.mrb[0].mxu0  ;;  %v783_v62 = vpop.f32.mrb[0].mxu1 }
 0x204   : > { %v743_v0 = vadd.f32 %v742_v60, %v607_v56  ;;  %v784_v1 = vadd.f32 %v783_v62, %v615_v57  ;;  %v744_v2 = vpop.f32.mrb[1].mxu0  ;;  %v785_v4 = vpop.f32.mrb[1].mxu1 }
 0x205   : > { %v745_v6 = vadd.f32 %v744_v2, %v611_v58  ;;  %v786_v7 = vadd.f32 %v785_v4, %v619_v59  ;;  %v746_v8 = vpop.f32.mrb[2].mxu0  ;;  %v787_v9 = vpop.f32.mrb[2].mxu1 }
 0x206   : > { %790 = vst [vmem:[%s1377_s10] sm:$0xff] %v743_v0  ;;  %v800_v10 = vsub.f32 %v796_v61, %v743_v0  ;;  %v802_v11 = vsub.f32 %v798_v63, %v784_v1  ;;  %v747_v12 = vpop.f32.mrb[3].mxu0  ;;  %v788_v13 = vpop.f32.mrb[3].mxu1  ;;  %792 = vst [vmem:[%s1377_s10 + $0x10] sm:$0xff] %v784_v1 }
 0x207   : > { %791 = vst [vmem:[%s1377_s10 + $0x8] sm:$0xff] %v745_v6  ;;  %v801_v15 = vsub.f32 %v797_v3, %v745_v6  ;;  %v803_v16 = vsub.f32 %v799_v5, %v786_v7  ;;  %793 = vst [vmem:[%s1377_s10 + $0x18] sm:$0xff] %v786_v7 }
 0x208   : > { %v804_v17 = vmul.f32 %v800_v10, %v800_v10  ;;  %v806_v18 = vmul.f32 %v802_v11, %v802_v11 }
 0x209   : > { %v805_v20 = vmul.f32 %v801_v15, %v801_v15  ;;  %v807_v21 = vmul.f32 %v803_v16, %v803_v16 }
 0x20a   : > { %v809_v22 = vmul.f32 %v808_v14, %v804_v17  ;;  %v811_v23 = vmul.f32 %v808_v14, %v806_v18 }
 0x20b   : > { %v810_v24 = vmul.f32 %v808_v14, %v805_v20  ;;  %v812_v25 = vmul.f32 %v808_v14, %v807_v21 }
 0x20c   : > { %v814_v26 = vadd.f32 %v813_v19, %v809_v22  ;;  %v816_v27 = vadd.f32 %v813_v19, %v811_v23 }
 0x20d   : > { %v815_v28 = vadd.f32 %v813_v19, %v810_v24  ;;  %v817_v29 = vadd.f32 %v813_v19, %v812_v25 }
 0x20e   : > { %818 = vst [vmem:[%s1382_s14] sm:$0xff] %v814_v26  ;;  %820 = vst [vmem:[%s1382_s14 + $0x10] sm:$0xff] %v816_v27 }
 0x20f   : > { %819 = vst [vmem:[%s1382_s14 + $0x8] sm:$0xff] %v815_v28  ;;  %821 = vst [vmem:[%s1382_s14 + $0x18] sm:$0xff] %v817_v29 }
 0x210 PF: > { %s20_s9 = sadd.s32 1, %s1215_s9   ;;  %s1463_s27 = smov %s1203_s28 }
 0x211   : > { %p17_p8 = scmp.ge.s32.totalorder %s20_s9, 4   ;;  %s1464_s28 = smov %s1317_s17 }
 0x212   : > { %s1465_s29 = smov %s1211_s30  ;;  %s1466_s30 = smov %s1468_s11 }
 0x213   :  { %19 = sbr.rel (!%p17_p8) target bundleno = 3 (0x3), region = 136 }
 0x21a   :  { %877 = vsyncpa [#allocation5], 1 }
 0x21b   :  { %879 = vsyncpa [#allocation5 + $0x1], 1 }

</bundles_post_ra>
